<compile_context>
chip_gen: v6e
topology: v6e:2x2x1
jax: 0.10.0
libtpu: 0.0.40
codegen_flags: <defaults>
</compile_context>

<pallas_src>
import functools

import numpy as np
import jax
import jax.numpy as jnp
from jax.experimental import pallas as pl
from jax.experimental.pallas import tpu as pltpu

_UNROLL_MAX = 8


def _smoother_diff(n_pixels, smoother):
    if smoother == "sigmoid":
        s = 1.0 / (1.0 + np.exp(-np.linspace(5.0, -5.0, n_pixels + 1)))
        s[0] = 1.0
        s[-1] = 0.0
    elif smoother == "linear":
        s = np.linspace(1.0, 0.0, n_pixels + 1)
    else:
        raise NotImplementedError(f"'{smoother}' smoothing method is not implemented.")
    return (-np.diff(s)).astype(np.float32)


def _vmem_budget():
    """(tile_target_bytes, vmem_limit_bytes); conservative on 64 MiB-VMEM chips (v7x)."""
    try:
        cap = pltpu.get_tpu_info().vmem_capacity_bytes
    except Exception:
        cap = 64 << 20
    if cap >= (100 << 20):            # v5e / v6e: 128 MiB physical VMEM
        return 4 << 20, 64 * 1024 * 1024
    return 2 << 20, 32 * 1024 * 1024  # v7x (64 MiB physical) or unknown


def _choose_tiling(B, Hp, Wp, target_bytes):
    """TB images packed per block (lane axis), G grid steps, L lane extent (mult. of 128)."""
    per_img = Hp * Wp * 4             # f32 footprint of one packed image
    tb = max(1, target_bytes // per_img)
    if B >= 2:                        # keep >= 2 grid steps so both v7x TCs get work
        tb = min(tb, -(-B // 2))
    tb = int(max(1, min(tb, B)))
    g = -(-B // tb)                   # B is padded up to g * tb with dummy zero planes
    L = -(-(tb * Wp) // 128) * 128    # lane-dense blocks (no masked partial stores)
    return tb, g, L


def _make_blur_kernel(n_pixels, Hp, L, compute_dtype, unroll):
    f32 = jnp.float32

    def dilate(cur, mask):
        # Re-zero separator / lane-pad cells so circular rolls see per-image zero pad.
        cz = cur * mask
        # Horizontal 3-neighborhood max (lane rolls -> XLU slot).
        m = jnp.maximum(cz, jnp.maximum(pltpu.roll(cz, 1, 1),
                                        pltpu.roll(cz, L - 1, 1)))
        # Vertical 3-neighborhood max (sublane rolls); separator rows of m are 0.
        return jnp.maximum(m, jnp.maximum(pltpu.roll(m, 1, 0),
                                          pltpu.roll(m, Hp - 1, 0)))

    def kernel(diffs_ref, mask_ref, x_ref, o_ref):
        mask = mask_ref[...]                        # (Hp, L) 0/1 mask, VMEM-resident
        cur = x_ref[0].astype(compute_dtype)        # (Hp, L)
        out = diffs_ref[0] * cur.astype(f32)        # accumulate in f32

        if unroll:
            for i in range(1, n_pixels):
                cur = dilate(cur, mask)
                out = out + diffs_ref[i] * cur.astype(f32)
        else:
            def body(i, carry):
                c, o = carry
                c = dilate(c, mask)
                o = o + diffs_ref[i] * c.astype(f32)
                return c, o
            cur, out = jax.lax.fori_loop(1, n_pixels, body, (cur, out))

        o_ref[0] = out.astype(o_ref.dtype)

    return kernel


@functools.partial(jax.jit, static_argnums=(1, 2))
def blur_outwards(x, n_pixels, smoother="linear"):
    """x: (N, C, H, W); each (n, c) plane is blurred independently (C == 1 in torch)."""
    N, C, H, W = x.shape
    d = _smoother_diff(n_pixels, smoother)

    B = N * C
    Wp = W + 1                                  # one zero separator column per image
    Hp = ((H + 1 + 7) // 8) * 8                 # >= 1 zero separator row, sublane aligned
    target_bytes, vmem_limit = _vmem_budget()
    TB, G, L = _choose_tiling(B, Hp, Wp, target_bytes)
    Bpad = G * TB

    # TODO(synk): a single plane whose ~9x working set exceeds scoped VMEM needs an
    # H-tiled grid with n_pixels-row halos; not implemented.
    # TODO(synk): for small W the host-side pack/unpack below costs one extra HBM
    # round-trip each way; an in-kernel pack (per-image DMA / einshape) would remove
    # it, but per-16x16-image DMAs are descriptor-overhead-bound, so it is left out.

    compute_dtype = jnp.bfloat16 if x.dtype == jnp.bfloat16 else jnp.float32

    # Pack: (B,H,W) -> zero-pad to (Bpad,Hp,Wp) -> TB images side by side along the
    # lane axis -> zero lane-pad tail up to L (multiple of 128).
    xb = x.reshape(B, H, W)
    xp = jnp.pad(xb, ((0, Bpad - B), (0, Hp - H), (0, Wp - W)))
    xg = xp.reshape(G, TB, Hp, Wp).transpose(0, 2, 1, 3).reshape(G, Hp, TB * Wp)
    xg = jnp.pad(xg, ((0, 0), (0, 0), (0, L - TB * Wp)))

    # Resident real-pixel mask (0 on separators and the lane-pad tail), built once
    # on the host instead of iota / `col % Wp` work in every grid step.
    row = np.arange(Hp)[:, None]
    col = np.arange(L)[None, :]
    real = (row < H) & (col < TB * Wp) & ((col % Wp) < W)
    mask = jnp.asarray(real.astype(np.float32)).astype(compute_dtype)

    diffs = jnp.asarray(d)                      # (n_pixels,) f32 -> SMEM

    kernel = _make_blur_kernel(n_pixels, Hp, L, compute_dtype,
                               unroll=(n_pixels <= _UNROLL_MAX))

    out = pl.pallas_call(
        kernel,
        out_shape=jax.ShapeDtypeStruct((G, Hp, L), x.dtype),
        grid=(G,),
        in_specs=[
            pl.BlockSpec(memory_space=pltpu.MemorySpace.SMEM),     # smoother diffs
            pl.BlockSpec((Hp, L), lambda g: (0, 0)),               # mask, resident
            pl.BlockSpec((1, Hp, L), lambda g: (g, 0, 0)),         # packed images
        ],
        out_specs=pl.BlockSpec((1, Hp, L), lambda g: (g, 0, 0)),
        input_output_aliases={2: 0},            # update the packed buffer in place
        compiler_params=pltpu.CompilerParams(
            dimension_semantics=("parallel",),
            vmem_limit_bytes=vmem_limit,
        ),
    )(diffs, mask, xg)

    # Unpack: drop lane-pad tail, un-interleave images, strip separators / dummies.
    ob = (out[:, :, :TB * Wp].reshape(G, Hp, TB, Wp)
          .transpose(0, 2, 1, 3).reshape(Bpad, Hp, Wp))
    return ob[:B, :H, :W].reshape(N, C, H, W)


def _reference(x, n_pixels, smoother="linear"):
    """Pure-JAX reference mirroring the torch forward (zero-pad 3x3 max dilation)."""
    d = _smoother_diff(n_pixels, smoother)
    out = jnp.zeros_like(x)
    cur = x
    for i in range(n_pixels):
        out = out + d[i] * cur
        p = jnp.pad(cur, ((0, 0), (0, 0), (1, 1), (1, 1)))
        cur = jax.lax.reduce_window(
            p, -jnp.inf, jax.lax.max, (1, 1, 3, 3), (1, 1, 1, 1), "VALID"
        )
    return out


if __name__ == "__main__":
    key = jax.random.PRNGKey(0)
    k1, k2, k3 = jax.random.split(key, 3)

    # Main check (C == 1, the only case the torch module's reshape supports).
    x1 = jax.random.normal(k1, (2, 1, 16, 16), dtype=jnp.float32)
    y1 = jax.block_until_ready(blur_outwards(x1, 4, "linear"))
    np.testing.assert_allclose(np.asarray(y1), np.asarray(_reference(x1, 4, "linear")),
                               rtol=1e-5, atol=1e-5)

    # Awkward batch (B=3 padded up to 4), non-square spatial dims.
    x2 = jax.random.normal(k2, (3, 1, 8, 24), dtype=jnp.float32)
    y2 = jax.block_until_ready(blur_outwards(x2, 3, "linear"))
    np.testing.assert_allclose(np.asarray(y2), np.asarray(_reference(x2, 3, "linear")),
                               rtol=1e-5, atol=1e-5)

    # Large n_pixels -> in-kernel fori_loop path (diffs read from SMEM), sigmoid smoother.
    x3 = jax.random.normal(k3, (2, 1, 16, 16), dtype=jnp.float32)
    y3 = jax.block_until_ready(blur_outwards(x3, 12, "sigmoid"))
    np.testing.assert_allclose(np.asarray(y3), np.asarray(_reference(x3, 12, "sigmoid")),
                               rtol=1e-5, atol=1e-5)

    print("KERNEL_OK")
</pallas_src>

<mosaic_0001>
module attributes {stable_mosaic.version = 11 : i64} {
  func.func @kernel(%arg0: i32, %arg1: memref<4xf32, #tpu.memory_space<smem>>, %arg2: memref<24x128xf32, #tpu.memory_space<vmem>>, %arg3: memref<1x24x128xf32, #tpu.memory_space<vmem>>, %arg4: memref<1x24x128xf32, #tpu.memory_space<vmem>>) attributes {dimension_semantics = [#tpu.dimension_semantics<parallel>], iteration_bounds = array<i64: 2>, scalar_prefetch = 0 : i64, scratch_operands = 0 : i64, tpu.core_type = #tpu.core_type<tc>, window_params = [{transform_indices = @transform_0, window_bounds = array<i64: 4>}, {pipeline_mode = #tpu.pipeline_mode<synchronous>, transform_indices = @transform_1, window_bounds = array<i64: 24, 128>}, {transform_indices = @transform_2, window_bounds = array<i64: 1, 24, 128>}, {transform_indices = @transform_3, window_bounds = array<i64: 1, 24, 128>}]} {
    %c0 = arith.constant 0 : index
    %c0_0 = arith.constant 0 : index
    %0 = vector.load %arg2[%c0, %c0_0] : memref<24x128xf32, #tpu.memory_space<vmem>>, vector<24x128xf32>
    %c0_1 = arith.constant 0 : index
    %c0_2 = arith.constant 0 : index
    %c0_3 = arith.constant 0 : index
    %1 = vector.load %arg3[%c0_1, %c0_2, %c0_3] : memref<1x24x128xf32, #tpu.memory_space<vmem>>, vector<1x24x128xf32>
    %2 = vector.shape_cast %1 : vector<1x24x128xf32> to vector<24x128xf32>
    %c0_4 = arith.constant 0 : index
    %3 = memref.load %arg1[%c0_4] : memref<4xf32, #tpu.memory_space<smem>>
    %4 = vector.broadcast %3 : f32 to vector<24x128xf32>
    %5 = arith.mulf %4, %2 : vector<24x128xf32>
    %6 = arith.mulf %2, %0 : vector<24x128xf32>
    %c1_i32 = arith.constant 1 : i32
    %7 = tpu.dynamic_rotate %6 by %c1_i32 dim 1 : vector<24x128xf32>, i32 -> vector<24x128xf32>
    %c127_i32 = arith.constant 127 : i32
    %8 = tpu.dynamic_rotate %6 by %c127_i32 dim 1 : vector<24x128xf32>, i32 -> vector<24x128xf32>
    %9 = arith.maximumf %7, %8 : vector<24x128xf32>
    %10 = arith.maximumf %6, %9 : vector<24x128xf32>
    %c1_i32_5 = arith.constant 1 : i32
    %11 = tpu.dynamic_rotate %10 by %c1_i32_5 dim 0 : vector<24x128xf32>, i32 -> vector<24x128xf32>
    %c23_i32 = arith.constant 23 : i32
    %12 = tpu.dynamic_rotate %10 by %c23_i32 dim 0 : vector<24x128xf32>, i32 -> vector<24x128xf32>
    %13 = arith.maximumf %11, %12 : vector<24x128xf32>
    %14 = arith.maximumf %10, %13 : vector<24x128xf32>
    %c1 = arith.constant 1 : index
    %15 = memref.load %arg1[%c1] : memref<4xf32, #tpu.memory_space<smem>>
    %16 = vector.broadcast %15 : f32 to vector<24x128xf32>
    %17 = arith.mulf %16, %14 : vector<24x128xf32>
    %18 = arith.addf %5, %17 : vector<24x128xf32>
    %19 = arith.mulf %14, %0 : vector<24x128xf32>
    %c1_i32_6 = arith.constant 1 : i32
    %20 = tpu.dynamic_rotate %19 by %c1_i32_6 dim 1 : vector<24x128xf32>, i32 -> vector<24x128xf32>
    %c127_i32_7 = arith.constant 127 : i32
    %21 = tpu.dynamic_rotate %19 by %c127_i32_7 dim 1 : vector<24x128xf32>, i32 -> vector<24x128xf32>
    %22 = arith.maximumf %20, %21 : vector<24x128xf32>
    %23 = arith.maximumf %19, %22 : vector<24x128xf32>
    %c1_i32_8 = arith.constant 1 : i32
    %24 = tpu.dynamic_rotate %23 by %c1_i32_8 dim 0 : vector<24x128xf32>, i32 -> vector<24x128xf32>
    %c23_i32_9 = arith.constant 23 : i32
    %25 = tpu.dynamic_rotate %23 by %c23_i32_9 dim 0 : vector<24x128xf32>, i32 -> vector<24x128xf32>
    %26 = arith.maximumf %24, %25 : vector<24x128xf32>
    %27 = arith.maximumf %23, %26 : vector<24x128xf32>
    %c2 = arith.constant 2 : index
    %28 = memref.load %arg1[%c2] : memref<4xf32, #tpu.memory_space<smem>>
    %29 = vector.broadcast %28 : f32 to vector<24x128xf32>
    %30 = arith.mulf %29, %27 : vector<24x128xf32>
    %31 = arith.addf %18, %30 : vector<24x128xf32>
    %32 = arith.mulf %27, %0 : vector<24x128xf32>
    %c1_i32_10 = arith.constant 1 : i32
    %33 = tpu.dynamic_rotate %32 by %c1_i32_10 dim 1 : vector<24x128xf32>, i32 -> vector<24x128xf32>
    %c127_i32_11 = arith.constant 127 : i32
    %34 = tpu.dynamic_rotate %32 by %c127_i32_11 dim 1 : vector<24x128xf32>, i32 -> vector<24x128xf32>
    %35 = arith.maximumf %33, %34 : vector<24x128xf32>
    %36 = arith.maximumf %32, %35 : vector<24x128xf32>
    %c1_i32_12 = arith.constant 1 : i32
    %37 = tpu.dynamic_rotate %36 by %c1_i32_12 dim 0 : vector<24x128xf32>, i32 -> vector<24x128xf32>
    %c23_i32_13 = arith.constant 23 : i32
    %38 = tpu.dynamic_rotate %36 by %c23_i32_13 dim 0 : vector<24x128xf32>, i32 -> vector<24x128xf32>
    %39 = arith.maximumf %37, %38 : vector<24x128xf32>
    %40 = arith.maximumf %36, %39 : vector<24x128xf32>
    %c3 = arith.constant 3 : index
    %41 = memref.load %arg1[%c3] : memref<4xf32, #tpu.memory_space<smem>>
    %42 = vector.broadcast %41 : f32 to vector<24x128xf32>
    %43 = arith.mulf %42, %40 : vector<24x128xf32>
    %44 = arith.addf %31, %43 : vector<24x128xf32>
    %c0_14 = arith.constant 0 : index
    %c0_15 = arith.constant 0 : index
    %c0_16 = arith.constant 0 : index
    %45 = vector.load %arg4[%c0_14, %c0_15, %c0_16] : memref<1x24x128xf32, #tpu.memory_space<vmem>>, vector<1x24x128xf32>
    %46 = vector.shape_cast %45 : vector<1x24x128xf32> to vector<24x128xf32>
    %47 = vector.shape_cast %44 : vector<24x128xf32> to vector<1x24x128xf32>
    tpu.vector_store %arg4[%c0_14, %c0_15, %c0_16], %47 {strides = array<i32>} : memref<1x24x128xf32, #tpu.memory_space<vmem>>, vector<1x24x128xf32>,
    return
  }
  func.func @transform_0(%arg0: i32) -> i32 {
    %c0_i32 = arith.constant 0 : i32
    %c0_i32_0 = arith.constant 0 : i32
    return %c0_i32 : i32
  }
  func.func @transform_1(%arg0: i32) -> (i32, i32) {
    %c0_i32 = arith.constant 0 : i32
    %c0_i32_0 = arith.constant 0 : i32
    %c0_i32_1 = arith.constant 0 : i32
    return %c0_i32, %c0_i32_0 : i32, i32
  }
  func.func @transform_2(%arg0: i32) -> (i32, i32, i32) {
    %c0_i32 = arith.constant 0 : i32
    %c0_i32_0 = arith.constant 0 : i32
    %c0_i32_1 = arith.constant 0 : i32
    return %arg0, %c0_i32, %c0_i32_0 : i32, i32, i32
  }
  func.func @transform_3(%arg0: i32) -> (i32, i32, i32) {
    %c0_i32 = arith.constant 0 : i32
    %c0_i32_0 = arith.constant 0 : i32
    %c0_i32_1 = arith.constant 0 : i32
    return %arg0, %c0_i32, %c0_i32_0 : i32, i32, i32
  }
}

</mosaic_0001>

<bundles_post_ra>
// kernel: blur_outwards.1
= control target key start
LH: loop header
LB: loop body
LE: loop exit
PB: predicated region body
PF: predicated region fallthrough
CT: control target
= control target key end

     0   :  { %8 = vsyncpa [#allocation3], 0  ;;  %s497_s12 = smov 0   ;;  %s629_s0 = inlined_call_operand.vmem [shape: f32[4], index: 0, kind: input, shape index: {}]   ;;  %s630_s1 = inlined_call_operand.vmem [shape: f32[24,128], index: 1, kind: input, shape index: {}]   ;;  %s631_s2 = inlined_call_operand.vmem [shape: f32[2,24,128], index: 2, kind: input, shape index: {}, may-alias: {2,3}]   ;;  %s632_s3 = inlined_call_operand.vmem [shape: f32[2,24,128], index: 3, kind: output, shape index: {}, may-alias: {2,3}]  }
   0x1 LB: > { %s411_s13 = sadd.s32 4294967295, %s472_s12   ;;  %p413_p0 = scmp.ge.s32.totalorder %s472_s12, 1  ;;  %s472_s12 = sphi %s497_s12, %s14_s12  }
   0x2   : > { %p113_p1 = scmp.lt.s32.totalorder %s472_s12, 3  ;;  %s126_s16 = sshll.u32 %s629_s0, 4  ;;  %s127_s16 = int_to_ptr.vmem [resolvable:$true] %s126_s16 }
   0x3   : > { %p434_p3 = scmp.eq.s32.totalorder %s411_s13, 0  ;;  %s447_s18 = scalar_lea.vmem %s127_s16, 16 }
   0x4   : > { %p508_p2 = pnand %p413_p0, %p113_p1  ;;  %p448_p6 = scmp.ne.s32.totalorder %s127_s16, %s447_s18 }
   0x5   : > { %p455_p10 = scmp.lt.s32.totalorder %s127_s16, %s127_s16  ;;  %p456_p11 = scmp.lt.s32.totalorder %s447_s18, %s447_s18 }
   0x6   : > { %p430_p4 = pneg %p508_p2 }
   0x7   : > { %p457_p12 = por %p456_p11, %p455_p10 }
   0x8   : > { %p431_p5 = pnand %p434_p3, %p430_p4 }
   0xa   : > { %p449_p7 = pneg %p431_p5 }
   0xc   : > { %p450_p8 = pnand %p449_p7, %p448_p6 }
   0xe   : > { %p451_p9 = pneg %p450_p8 }
  0x10   : > { %p458_p13 = pnand %p457_p12, %p451_p9 }
  0x12   : > { %461 = shalt.err (!%p458_p13)
}
  0x13   : > { %s474_s19 = smov [#allocation2]   ;;  %150 = sbr.rel (%p508_p2) target bundleno = 448 (0x1c0), region = 32 }
  0x14   : > { %433 = dma.vmem_to_smem (!%p431_p5), %s127_s16, 16, %s474_s19, [#allocation3]  }
  0x18   : > { %467 = dma.done.wait (%p434_p3), [#allocation3], 16  }
  0x19   : > { %469 = vsyncadd (%p434_p3), [#allocation3], 4294967280 }
  0x1a   : > { %156 = sfence }
  0x1b   : > { %p175_p0 = scmp.lt.s32.totalorder %s411_s13, 1  ;;  %v525_v0 = vld [vmem:[%s630_s1 + $0x10] sm:$0xff]  ;;  %v530_v1 = vld [vmem:[%s630_s1] sm:$0xff]  ;;  %v540_v2 = vld [vmem:[%s630_s1 + $0x8] sm:$0xff]  ;;  %s475_s30 = smov 1   ;;  %v220_v13 = vlaneseq }
  0x1c   : > { %s476_s4 = smov 127   ;;  %s191_s5 = sld [smem:[#allocation2]] }
  0x1d   : > { %s635_s13 = smov (!%p175_p0, %s411_s13), 1  ;;  %v560_v18 = vshrl.u32 %v220_v13, 7  ;;  %s420_s6 = sld [smem:[#allocation2 + $0x1]] }
  0x1e   : > { %s425_s20 = smul.u32 24, %s635_s13  ;;  %s421_s7 = sld [smem:[#allocation2 + $0x2]] }
  0x1f   : > { %vm222_vm0 = vcmp.lt.s32.totalorder %v560_v18, 1  ;;  %vm229_vm1 = vcmp.lt.s32.totalorder %v560_v18, 7  ;;  %s422_s8 = sld [smem:[#allocation2 + $0x3]] }
  0x20   : > { %s179_s27 = scalar_lea.vmem %s631_s2, %s425_s20  ;;  %s184_s11 = scalar_lea.vmem %s632_s3, %s425_s20 }
  0x21   : > { %v542_v3 = vld [vmem:[%s179_s27 + $0x10] sm:$0xff]  ;;  %v544_v4 = vld [vmem:[%s179_s27] sm:$0xff]  ;;  %v546_v5 = vld [vmem:[%s179_s27 + $0x8] sm:$0xff] }
  0x22   : > { %v198_v6 = vmul.f32 %v542_v3, %v525_v0  ;;  %v196_v7 = vmul.f32 %v544_v4, %v530_v1  ;;  %v197_v8 = vmul.f32 %v546_v5, %v540_v2  ;;  %v192_v54 = vstv %s191_s5 }
  0x23   : > { %v240_v55 = vstv %s420_s6 }
  0x24   : > { %203 = vrot.lane.b32.xlu1 %v198_v6, %s475_s30  ;;  %199 = vrot.lane.b32.xlu0 %v196_v7, %s475_s30 }
  0x28   : > { %205 = vrot.lane.b32.xlu1 %v196_v7, %s476_s4  ;;  %201 = vrot.lane.b32.xlu0 %v197_v8, %s475_s30 }
  0x2c   : > { %209 = vrot.lane.b32.xlu1 %v198_v6, %s476_s4  ;;  %207 = vrot.lane.b32.xlu0 %v197_v8, %s476_s4 }
  0x96   : > { %v204_v9 = vpop.permute.xlu1 %203  ;;  %v200_v10 = vpop.permute.xlu0 %199 }
  0x9a   : > { %v206_v11 = vpop.permute.xlu1 %205  ;;  %v202_v12 = vpop.permute.xlu0 %201 }
  0x9b   : > { %v211_v14 = vmax.f32 %v200_v10, %v206_v11 }
  0x9d   : > { %v214_v15 = vmax.f32 %v196_v7, %v211_v14 }
  0x9e   : > { %v210_v16 = vpop.permute.xlu1 %209  ;;  %v208_v17 = vpop.permute.xlu0 %207 }
  0x9f   : > { %v213_v19 = vmax.f32 %v204_v9, %v210_v16  ;;  %v212_v20 = vmax.f32 %v202_v12, %v208_v17  ;;  %v217_v23 = vrot.slane %v214_v15, 7  ;;  %v226_v24 = vrot.slane %v214_v15, 1 }
  0xa0   : > { %v195_v16 = vmul.f32 %v192_v54, %v542_v3 }
  0xa1   : > { %v216_v21 = vmax.f32 %v198_v6, %v213_v19  ;;  %v215_v22 = vmax.f32 %v197_v8, %v212_v20  ;;  %v193_v6 = vmul.f32 %v192_v54, %v544_v4  ;;  %v194_v8 = vmul.f32 %v192_v54, %v546_v5 }
  0xa2   : > { %v287_v19 = vstv %s421_s7 }
  0xa3   : > { %v219_v25 = vrot.slane %v216_v21, 7  ;;  %v228_v26 = vrot.slane %v216_v21, 1  ;;  %v218_v27 = vrot.slane %v215_v22, 7  ;;  %v227_v28 = vrot.slane %v215_v22, 1 }
  0xa5   : > { %v225_v29 = vsel %vm222_vm0, %v219_v25, %v217_v23  ;;  %v231_v30 = vsel %vm229_vm1, %v226_v24, %v227_v28  ;;  %v224_v31 = vsel %vm222_vm0, %v217_v23, %v218_v27  ;;  %v230_v32 = vsel %vm229_vm1, %v227_v28, %v228_v26 }
  0xa6   : > { %v233_v33 = vmax.f32 %v225_v29, %v231_v30  ;;  %v234_v34 = vmax.f32 %v224_v31, %v230_v32  ;;  %v223_v35 = vsel %vm222_vm0, %v218_v27, %v219_v25  ;;  %v232_v36 = vsel %vm229_vm1, %v228_v26, %v226_v24 }
  0xa7   : > { %v235_v37 = vmax.f32 %v223_v35, %v232_v36 }
  0xa8   : > { %v236_v38 = vmax.f32 %v214_v15, %v233_v33  ;;  %v237_v39 = vmax.f32 %v215_v22, %v234_v34 }
  0xa9   : > { %v238_v42 = vmax.f32 %v216_v21, %v235_v37 }
  0xaa   : > { %v247_v40 = vmul.f32 %v236_v38, %v530_v1  ;;  %v248_v41 = vmul.f32 %v237_v39, %v540_v2  ;;  %v241_v7 = vmul.f32 %v240_v55, %v236_v38  ;;  %v242_v9 = vmul.f32 %v240_v55, %v237_v39 }
  0xab   : > { %v249_v43 = vmul.f32 %v238_v42, %v525_v0  ;;  %v243_v17 = vmul.f32 %v240_v55, %v238_v42 }
  0xac   : > { %250 = vrot.lane.b32.xlu0 %v247_v40, %s475_s30  ;;  %252 = vrot.lane.b32.xlu1 %v248_v41, %s475_s30  ;;  %v244_v23 = vadd.f32 %v241_v7, %v193_v6  ;;  %v245_v24 = vadd.f32 %v242_v9, %v194_v8 }
  0xad   : > { %v246_v30 = vadd.f32 %v243_v17, %v195_v16 }
  0xb0   : > { %256 = vrot.lane.b32.xlu1 %v247_v40, %s476_s4  ;;  %254 = vrot.lane.b32.xlu0 %v249_v43, %s475_s30 }
  0xb4   : > { %260 = vrot.lane.b32.xlu1 %v249_v43, %s476_s4  ;;  %258 = vrot.lane.b32.xlu0 %v248_v41, %s476_s4 }
 0x11e   : > { %v251_v44 = vpop.permute.xlu0 %250  ;;  %v253_v45 = vpop.permute.xlu1 %252 }
 0x122   : > { %v257_v46 = vpop.permute.xlu1 %256  ;;  %v255_v47 = vpop.permute.xlu0 %254 }
 0x123   : > { %v262_v48 = vmax.f32 %v251_v44, %v257_v46 }
 0x125   : > { %v265_v49 = vmax.f32 %v247_v40, %v262_v48 }
 0x126   : > { %v261_v50 = vpop.permute.xlu1 %260  ;;  %v259_v51 = vpop.permute.xlu0 %258 }
 0x127   : > { %v264_v52 = vmax.f32 %v255_v47, %v261_v50  ;;  %v263_v53 = vmax.f32 %v253_v45, %v259_v51  ;;  %v268_v58 = vrot.slane %v265_v49, 7  ;;  %v274_v59 = vrot.slane %v265_v49, 1 }
 0x129   : > { %v267_v56 = vmax.f32 %v249_v43, %v264_v52  ;;  %v266_v57 = vmax.f32 %v248_v41, %v263_v53 }
 0x12b   : > { %v270_v60 = vrot.slane %v267_v56, 7  ;;  %v276_v61 = vrot.slane %v267_v56, 1  ;;  %v269_v62 = vrot.slane %v266_v57, 7  ;;  %v275_v63 = vrot.slane %v266_v57, 1 }
 0x12d   : > { %v273_v10 = vsel %vm222_vm0, %v270_v60, %v268_v58  ;;  %v278_v11 = vsel %vm229_vm1, %v274_v59, %v275_v63  ;;  %v272_v12 = vsel %vm222_vm0, %v268_v58, %v269_v62  ;;  %v277_v13 = vsel %vm229_vm1, %v275_v63, %v276_v61 }
 0x12e   : > { %v280_v14 = vmax.f32 %v273_v10, %v278_v11  ;;  %v281_v15 = vmax.f32 %v272_v12, %v277_v13  ;;  %v271_v4 = vsel %vm222_vm0, %v269_v62, %v270_v60  ;;  %v279_v5 = vsel %vm229_vm1, %v276_v61, %v274_v59 }
 0x12f   : > { %v282_v20 = vmax.f32 %v271_v4, %v279_v5 }
 0x130   : > { %v283_v21 = vmax.f32 %v265_v49, %v280_v14  ;;  %v284_v22 = vmax.f32 %v266_v57, %v281_v15  ;;  %v334_v57 = vstv %s422_s8 }
 0x131   : > { %v285_v25 = vmax.f32 %v267_v56, %v282_v20 }
 0x132   : > { %v294_v26 = vmul.f32 %v283_v21, %v530_v1  ;;  %v288_v27 = vmul.f32 %v287_v19, %v283_v21  ;;  %v295_v28 = vmul.f32 %v284_v22, %v540_v2  ;;  %v289_v29 = vmul.f32 %v287_v19, %v284_v22 }
 0x133   : > { %v290_v31 = vmul.f32 %v287_v19, %v285_v25  ;;  %v296_v34 = vmul.f32 %v285_v25, %v525_v0 }
 0x134   : > { %297 = vrot.lane.b32.xlu0 %v294_v26, %s475_s30  ;;  %v291_v32 = vadd.f32 %v288_v27, %v244_v23  ;;  %299 = vrot.lane.b32.xlu1 %v295_v28, %s475_s30  ;;  %v292_v3 = vadd.f32 %v289_v29, %v245_v24 }
 0x135   : > { %v293_v33 = vadd.f32 %v290_v31, %v246_v30 }
 0x138   : > { %303 = vrot.lane.b32.xlu1 %v294_v26, %s476_s4  ;;  %301 = vrot.lane.b32.xlu0 %v296_v34, %s475_s30 }
 0x13c   : > { %307 = vrot.lane.b32.xlu1 %v296_v34, %s476_s4  ;;  %305 = vrot.lane.b32.xlu0 %v295_v28, %s476_s4 }
 0x1a6   : > { %v298_v1 = vpop.permute.xlu0 %297  ;;  %v300_v2 = vpop.permute.xlu1 %299 }
 0x1aa   : > { %v304_v35 = vpop.permute.xlu1 %303  ;;  %v302_v36 = vpop.permute.xlu0 %301 }
 0x1ab   : > { %v309_v37 = vmax.f32 %v298_v1, %v304_v35 }
 0x1ad   : > { %v312_v38 = vmax.f32 %v294_v26, %v309_v37 }
 0x1ae   : > { %v308_v39 = vpop.permute.xlu1 %307  ;;  %v306_v40 = vpop.permute.xlu0 %305 }
 0x1af   : > { %v311_v41 = vmax.f32 %v302_v36, %v308_v39  ;;  %v310_v42 = vmax.f32 %v300_v2, %v306_v40  ;;  %v315_v44 = vrot.slane %v312_v38, 7  ;;  %v321_v45 = vrot.slane %v312_v38, 1 }
 0x1b1   : > { %v314_v0 = vmax.f32 %v296_v34, %v311_v41  ;;  %v313_v43 = vmax.f32 %v295_v28, %v310_v42 }
 0x1b3   : > { %v317_v46 = vrot.slane %v314_v0, 7  ;;  %v323_v47 = vrot.slane %v314_v0, 1  ;;  %v316_v48 = vrot.slane %v313_v43, 7  ;;  %v322_v49 = vrot.slane %v313_v43, 1 }
 0x1b5   : > { %v320_v50 = vsel %vm222_vm0, %v317_v46, %v315_v44  ;;  %v326_v51 = vsel %vm229_vm1, %v323_v47, %v321_v45  ;;  %v318_v52 = vsel %vm222_vm0, %v316_v48, %v317_v46  ;;  %v319_v53 = vsel %vm222_vm0, %v315_v44, %v316_v48 }
 0x1b6   : > { %v324_v54 = vsel %vm229_vm1, %v322_v49, %v323_v47  ;;  %v325_v55 = vsel %vm229_vm1, %v321_v45, %v322_v49  ;;  %v329_v56 = vmax.f32 %v318_v52, %v326_v51 }
 0x1b7   : > { %v327_v58 = vmax.f32 %v320_v50, %v325_v55  ;;  %v328_v59 = vmax.f32 %v319_v53, %v324_v54 }
 0x1b8   : > { %v332_v60 = vmax.f32 %v314_v0, %v329_v56 }
 0x1b9   : > { %v330_v61 = vmax.f32 %v312_v38, %v327_v58  ;;  %v331_v62 = vmax.f32 %v313_v43, %v328_v59 }
 0x1ba   : > { %v337_v63 = vmul.f32 %v334_v57, %v332_v60 }
 0x1bb   : > { %v335_v6 = vmul.f32 %v334_v57, %v330_v61  ;;  %v336_v7 = vmul.f32 %v334_v57, %v331_v62 }
 0x1bc   : > { %v340_v8 = vadd.f32 %v337_v63, %v293_v33 }
 0x1bd   : > { %v338_v9 = vadd.f32 %v335_v6, %v291_v32  ;;  %v339_v10 = vadd.f32 %v336_v7, %v292_v3 }
 0x1be   : > { %343 = vst [vmem:[%s184_s11 + $0x10] sm:$0xff] %v340_v8 }
 0x1bf   : > { %341 = vst [vmem:[%s184_s11] sm:$0xff] %v338_v9  ;;  %342 = vst [vmem:[%s184_s11 + $0x8] sm:$0xff] %v339_v10 }
 0x1c0 PF: > { %s14_s12 = sadd.s32 1, %s472_s12  }
 0x1c1   : > { %p11_p1 = scmp.ge.s32.totalorder %s14_s12, 4  }
 0x1c3   :  { %13 = sbr.rel (!%p11_p1) target bundleno = 1 (0x1), region = 67 }
 0x1c8   :  { %365 = vsyncpa [#allocation3], 1 }
 0x1c9   :  { %367 = vsyncpa [#allocation3 + $0x1], 1 }

</bundles_post_ra>
